<compile_context>
chip_gen: v6e
topology: v6e:2x2x1
jax: 0.10.0
libtpu: 0.0.40
codegen_flags: <defaults>
</compile_context>

<pallas_src>
import jax
import jax.numpy as jnp
import numpy as np
from jax.experimental import pallas as pl
from jax.experimental.pallas import tpu as pltpu


def _round_up(x, m):
    return ((x + m - 1) // m) * m


def _pick_tile_m(M):
    """Row tile for the (M, Kp) x (Kp, Cout) matmul."""
    if M <= 1024:
        # Single (near-)exact block; 8-aligned sublanes.
        return _round_up(M, 8)
    tm = min(2048, _round_up(M, 128))
    # v7x has 2 TensorCores: keep the parallel grid >= 2 steps when there is
    # enough work, otherwise one core idles.
    if pl.cdiv(M, tm) < 2:
        tm = _round_up(pl.cdiv(M, 2), 128)
    return tm


def _matmul_bias_kernel(p_ref, w_ref, b_ref, o_ref):
    # p_ref: (tm, Kp)   bf16 im2col patches tile
    # w_ref: (Kp, Cout) bf16 reshaped conv weight (VMEM-resident across grid)
    # b_ref: (1,  Cout) f32 bias                 (VMEM-resident across grid)
    # o_ref: (tm, Cout) output tile at the real channel width (no N padding)
    acc = jnp.dot(p_ref[...], w_ref[...], preferred_element_type=jnp.float32)
    o_ref[...] = (acc + b_ref[...]).astype(o_ref.dtype)


def patch_embed_forward(x, weight, bias, stride, padding):
    """x: (B, C_in, H, W); weight: (C_out, C_in, kh, kw); bias: (C_out,)."""
    B, Cin, H, W = x.shape
    Cout, _, kh, kw = weight.shape
    sh, sw = stride
    ph, pw = padding

    Hout = (H + 2 * ph - kh) // sh + 1
    Wout = (W + 2 * pw - kw) // sw + 1

    K = Cin * kh * kw
    M = B * Hout * Wout
    Kp = _round_up(K, 128)          # lane-aligned K (e.g. 196 -> 256)
    out_dtype = x.dtype

    # --- glue: zero-pad + im2col, built as ONE concatenate that already
    #     includes the K -> Kp zero columns (single materialization).
    xp = jnp.pad(x.astype(jnp.bfloat16), ((0, 0), (0, 0), (ph, ph), (pw, pw)))
    cols = []
    # ordering (cin, ki, kj) matches weight.reshape(Cout, Cin*kh*kw)
    for ci in range(Cin):
        for ki in range(kh):
            for kj in range(kw):
                cols.append(
                    xp[:, ci, ki:ki + Hout * sh:sh, kj:kj + Wout * sw:sw][..., None])
    if Kp > K:
        cols.append(jnp.zeros((B, Hout, Wout, Kp - K), dtype=jnp.bfloat16))
    patches = jnp.concatenate(cols, axis=-1).reshape(M, Kp)     # (M, Kp) bf16

    w_mat = weight.reshape(Cout, K).T.astype(jnp.bfloat16)      # (K, Cout) bf16
    w_mat = jnp.pad(w_mat, ((0, Kp - K), (0, 0)))               # tiny (Kp, Cout)
    b_mat = bias.reshape(1, Cout).astype(jnp.float32)           # (1, Cout) f32

    tm = _pick_tile_m(M)
    grid_m = pl.cdiv(M, tm)

    cost = pl.CostEstimate(
        flops=2 * M * Kp * Cout,
        transcendentals=0,
        bytes_accessed=(M * Kp * 2 + Kp * Cout * 2 + Cout * 4
                        + M * Cout * jnp.dtype(out_dtype).itemsize),
    )

    # --- hot path: Pallas matmul + bias (MXU, f32 accumulation) ---
    out_flat = pl.pallas_call(
        _matmul_bias_kernel,
        out_shape=jax.ShapeDtypeStruct((M, Cout), out_dtype),
        grid_spec=pltpu.PrefetchScalarGridSpec(
            num_scalar_prefetch=0,
            grid=(grid_m,),
            in_specs=[
                pl.BlockSpec((tm, Kp), lambda i: (i, 0)),      # patches tile
                pl.BlockSpec((Kp, Cout), lambda i: (0, 0)),    # weight (resident)
                pl.BlockSpec((1, Cout), lambda i: (0, 0)),     # bias   (resident)
            ],
            out_specs=pl.BlockSpec((tm, Cout), lambda i: (i, 0)),
        ),
        compiler_params=pltpu.CompilerParams(
            dimension_semantics=("parallel",)),
        cost_estimate=cost,
    )(patches, w_mat, b_mat)

    # (B, L, C) sequence layout == reshape(B, C, -1).transpose(2, 1); no slice
    # needed since the kernel already wrote exactly (M, Cout).
    return out_flat.reshape(B, Hout * Wout, Cout)


if __name__ == "__main__":
    # Small deterministic config: dim_in=4, dim_out=32, kernel=(7,7),
    # stride=(4,4), padding=(3,3)
    B, Cin, H, W = 2, 4, 16, 16
    Cout, kh, kw = 32, 7, 7
    stride = (4, 4)
    padding = (3, 3)

    key = jax.random.PRNGKey(0)
    kx, kw_, kb = jax.random.split(key, 3)
    x = jax.random.normal(kx, (B, Cin, H, W), dtype=jnp.float32)
    weight = jax.random.normal(kw_, (Cout, Cin, kh, kw), dtype=jnp.float32) * 0.05
    bias = jax.random.normal(kb, (Cout,), dtype=jnp.float32) * 0.05

    out = patch_embed_forward(x, weight, bias, stride, padding)
    out = jax.block_until_ready(out)

    # Reference: XLA conv + flatten + transpose (same semantics as the module)
    ref_conv = jax.lax.conv_general_dilated(
        x, weight, window_strides=stride,
        padding=[(padding[0], padding[0]), (padding[1], padding[1])],
        dimension_numbers=("NCHW", "OIHW", "NCHW"))
    ref_conv = ref_conv + bias.reshape(1, Cout, 1, 1)
    ref = ref_conv.reshape(B, Cout, -1).transpose(0, 2, 1)

    # bf16 dot operands (f32 accumulation) -> loosened tolerance vs f32 reference
    np.testing.assert_allclose(np.asarray(out), np.asarray(ref), rtol=2e-2, atol=2e-2)

    Hout = (H + 2 * padding[0] - kh) // stride[0] + 1
    Wout = (W + 2 * padding[1] - kw) // stride[1] + 1
    assert out.shape == (B, Hout * Wout, Cout)
    print("KERNEL_OK")
</pallas_src>

<mosaic_0001>
module attributes {stable_mosaic.version = 11 : i64} {
  func.func @_matmul_bias_kernel(%arg0: i32, %arg1: memref<32x256xbf16, #tpu.memory_space<vmem>>, %arg2: memref<256x32xbf16, #tpu.memory_space<vmem>>, %arg3: memref<1x32xf32, #tpu.memory_space<vmem>>, %arg4: memref<32x32xf32, #tpu.memory_space<vmem>>) attributes {dimension_semantics = [#tpu.dimension_semantics<parallel>], iteration_bounds = array<i64: 1>, scalar_prefetch = 0 : i64, scratch_operands = 0 : i64, tpu.core_type = #tpu.core_type<tc>, window_params = [{transform_indices = @transform_0, window_bounds = array<i64: 32, 256>}, {pipeline_mode = #tpu.pipeline_mode<synchronous>, transform_indices = @transform_1, window_bounds = array<i64: 256, 32>}, {pipeline_mode = #tpu.pipeline_mode<synchronous>, transform_indices = @transform_2, window_bounds = array<i64: 1, 32>}, {transform_indices = @transform_3, window_bounds = array<i64: 32, 32>}]} {
    %c0 = arith.constant 0 : index
    %c0_0 = arith.constant 0 : index
    %0 = vector.load %arg1[%c0, %c0_0] : memref<32x256xbf16, #tpu.memory_space<vmem>>, vector<32x256xbf16>
    %c0_1 = arith.constant 0 : index
    %c0_2 = arith.constant 0 : index
    %1 = vector.load %arg2[%c0_1, %c0_2] : memref<256x32xbf16, #tpu.memory_space<vmem>>, vector<256x32xbf16>
    %cst = arith.constant dense<0.000000e+00> : vector<32x32xf32>
    %2 = tpu.matmul %0, %1, %cst {dimension_numbers = #tpu.dot_dimension_numbers<[1], [0], [0], [1], [0, 0, 1, 1], [], []>} : vector<32x256xbf16>, vector<256x32xbf16>, vector<32x32xf32> -> vector<32x32xf32>
    %c0_3 = arith.constant 0 : index
    %c0_4 = arith.constant 0 : index
    %3 = vector.load %arg3[%c0_3, %c0_4] : memref<1x32xf32, #tpu.memory_space<vmem>>, vector<1x32xf32>
    %4 = vector.broadcast %3 : vector<1x32xf32> to vector<32x32xf32>
    %5 = arith.addf %2, %4 : vector<32x32xf32>
    %c0_5 = arith.constant 0 : index
    %c0_6 = arith.constant 0 : index
    %6 = vector.load %arg4[%c0_5, %c0_6] : memref<32x32xf32, #tpu.memory_space<vmem>>, vector<32x32xf32>
    tpu.vector_store %arg4[%c0_5, %c0_6], %5 {strides = array<i32>} : memref<32x32xf32, #tpu.memory_space<vmem>>, vector<32x32xf32>,
    return
  }
  func.func @transform_0(%arg0: i32) -> (i32, i32) {
    %c0_i32 = arith.constant 0 : i32
    %c0_i32_0 = arith.constant 0 : i32
    return %arg0, %c0_i32 : i32, i32
  }
  func.func @transform_1(%arg0: i32) -> (i32, i32) {
    %c0_i32 = arith.constant 0 : i32
    %c0_i32_0 = arith.constant 0 : i32
    %c0_i32_1 = arith.constant 0 : i32
    return %c0_i32, %c0_i32_0 : i32, i32
  }
  func.func @transform_2(%arg0: i32) -> (i32, i32) {
    %c0_i32 = arith.constant 0 : i32
    %c0_i32_0 = arith.constant 0 : i32
    %c0_i32_1 = arith.constant 0 : i32
    return %c0_i32, %c0_i32_0 : i32, i32
  }
  func.func @transform_3(%arg0: i32) -> (i32, i32) {
    %c0_i32 = arith.constant 0 : i32
    %c0_i32_0 = arith.constant 0 : i32
    return %arg0, %c0_i32 : i32, i32
  }
}

</mosaic_0001>

<bundles_post_ra>
// kernel: tpu_custom_call.1
= control target key start
LH: loop header
LB: loop body
LE: loop exit
PB: predicated region body
PF: predicated region fallthrough
CT: control target
= control target key end

     0   :  { %s450_s0 = inlined_call_operand.vmem [shape: bf16[32,256], index: 0, kind: input, shape index: {}]   ;;  %s451_s1 = inlined_call_operand.vmem [shape: bf16[256,32], index: 1, kind: input, shape index: {}]   ;;  %s452_s2 = inlined_call_operand.vmem [shape: f32[1,32], index: 2, kind: input, shape index: {}]   ;;  %s453_s3 = inlined_call_operand.hbm [shape: f32[32,32], index: 3, kind: output, shape index: {}]  }
   0x1   :  { %v313_v0 = vld [vmem:[%s451_s1 + $0x78] sm:$0xff]   ;;  %v315_v2 = vld [vmem:[%s451_s1 + $0x70] sm:$0xff]   ;;  %v317_v4 = vld [vmem:[%s451_s1 + $0x68] sm:$0xff]  }
   0x2   :  { %v314_v1 = vld [vmem:[%s451_s1 + $0x38] sm:$0xff]   ;;  %266 = vmatprep.subr.bf16.mxu0 %v313_v0  ;;  %294 = vmatprep.subr.bf16.mxu1 %v313_v0  ;;  %v316_v3 = vld [vmem:[%s451_s1 + $0x30] sm:$0xff]   ;;  %v318_v5 = vld [vmem:[%s451_s1 + $0x28] sm:$0xff]  }
   0x3   :  { %267 = vmatpush3.bf16.msra.mxu0 %v314_v1  ;;  %302 = vmatpush3.bf16.msra.mxu1 %v314_v1  ;;  %v319_v6 = vld [vmem:[%s451_s1 + $0x60] sm:$0xff]   ;;  %v321_v8 = vld [vmem:[%s451_s1 + $0x58] sm:$0xff]   ;;  %v323_v10 = vld [vmem:[%s451_s1 + $0x50] sm:$0xff]  }
   0x4   :  { %268 = vmatprep.subr.bf16.mxu0 %v315_v2  ;;  %295 = vmatprep.subr.bf16.mxu1 %v315_v2  ;;  %v320_v7 = vld [vmem:[%s451_s1 + $0x20] sm:$0xff]   ;;  %v322_v9 = vld [vmem:[%s451_s1 + $0x18] sm:$0xff]  }
   0x5   :  { %v331_v11 = vld [vmem:[%s450_s0 + $0x4] ss:$8 sps:$4 sm:$0xff]   ;;  %v334_v12 = vld [vmem:[%s450_s0 + $0x14] ss:$8 sps:$4 sm:$0xff]  }
   0x7   :  { %269 = vmatpush3.bf16.msra.mxu0 %v316_v3  ;;  %303 = vmatpush3.bf16.msra.mxu1 %v316_v3 }
   0x8   :  { %270 = vmatprep.subr.bf16.mxu0 %v317_v4  ;;  %296 = vmatprep.subr.bf16.mxu1 %v317_v4 }
   0xb   :  { %271 = vmatpush3.bf16.msra.mxu0 %v318_v5  ;;  %304 = vmatpush3.bf16.msra.mxu1 %v318_v5 }
   0xc   :  { %272 = vmatprep.subr.bf16.mxu0 %v319_v6  ;;  %297 = vmatprep.subr.bf16.mxu1 %v319_v6 }
   0xf   :  { %273 = vmatpush3.bf16.msra.mxu0 %v320_v7  ;;  %305 = vmatpush3.bf16.msra.mxu1 %v320_v7 }
  0x10   :  { %274 = vmatprep.subr.bf16.mxu0 %v321_v8  ;;  %298 = vmatprep.subr.bf16.mxu1 %v321_v8 }
  0x11   :  { %8 = vsyncpa [#allocation3], 0  ;;  %v324_v13 = vld [vmem:[%s451_s1 + $0x10] sm:$0xff]   ;;  %v325_v14 = vld [vmem:[%s451_s1 + $0x48] sm:$0xff]   ;;  %207 = vmatprep.mubr.bf16.mxu0 %v331_v11  ;;  %215 = vmatprep.mubr.bf16.mxu1 %v334_v12  ;;  %vm224_vm0 = vcmask 261120  }
  0x12   :  { %v326_v15 = vld [vmem:[%s451_s1 + $0x8] sm:$0xff]   ;;  %v327_v16 = vld [vmem:[%s451_s1 + $0x40] sm:$0xff]   ;;  %v332_v19 = vld [vmem:[%s450_s0 + $0x10] ss:$8 sps:$4 sm:$0xff]  }
  0x13   :  { %275 = vmatpush3.bf16.msra.mxu0 %v322_v9  ;;  %306 = vmatpush3.bf16.msra.mxu1 %v322_v9  ;;  %v328_v17 = vld [vmem:[%s451_s1] sm:$0xff]  }
  0x14   :  { %276 = vmatprep.subr.bf16.mxu0 %v323_v10  ;;  %299 = vmatprep.subr.bf16.mxu1 %v323_v10  ;;  %v329_v18 = vld [vmem:[%s450_s0] ss:$8 sps:$4 sm:$0xff]   ;;  %s357_s0 = smov [#allocation2]  }
  0x15   :  { %v245_v22 = vld [vmem:[%s452_s2] ss:$0 sm:$0xff]  ;;  %s234_s1 = sshll.u32 %s357_s0, 4  ;;  %s235_s1 = int_to_ptr.vmem [resolvable:$true] %s234_s1 }
  0x16   :  { %s335_s2 = scalar_lea.vmem %s235_s1, 512  ;;  %p340_p1 = scmp.lt.s32.totalorder %s235_s1, %s235_s1 }
  0x17   :  { %277 = vmatpush3.bf16.msra.mxu0 %v324_v13  ;;  %307 = vmatpush3.bf16.msra.mxu1 %v324_v13  ;;  %p336_p0 = scmp.ne.s32.totalorder %s235_s1, %s335_s2  ;;  %p341_p2 = scmp.lt.s32.totalorder %s335_s2, %s335_s2 }
  0x18   :  { %278 = vmatprep.subr.bf16.mxu0 %v325_v14  ;;  %300 = vmatprep.subr.bf16.mxu1 %v325_v14 }
  0x19   :  { %p342_p3 = por %p341_p2, %p340_p1 }
  0x1b   :  { %279 = vmatpush3.bf16.msra.mxu0 %v326_v15  ;;  %308 = vmatpush3.bf16.msra.mxu1 %v326_v15  ;;  %p343_p4 = pnand %p342_p3, %p336_p0 }
  0x1c   :  { %280 = vmatprep.subr.bf16.mxu0 %v327_v16  ;;  %301 = vmatprep.subr.bf16.mxu1 %v327_v16 }
  0x1f   :  { %281 = vmatpush3.bf16.msra.mxu0 %v328_v17  ;;  %309 = vmatpush3.bf16.msra.mxu1 %v328_v17 }
  0x22   :  { %208 = vmatmul.mubr.bf16.vlgmr.msra.gmra.mxu0 %v329_v18  ;;  %216 = vmatmul.mubr.bf16.vlgmr.msra.gmra.mxu1 %v332_v19 }
  0xe2   :  { %v282_v20 = vpop.f32.mrf.mxu0  ;;  %v288_v21 = vpop.f32.mrf.mxu1 }
  0xe4   :  { %v283_v23 = vpop.f32.mrf.mxu0  ;;  %v289_v24 = vpop.f32.mrf.mxu1 }
  0xe5   :  { %v284_v25 = vadd.f32 %v283_v23, %v282_v20  ;;  %v290_v26 = vadd.f32 %v289_v24, %v288_v21 }
  0xe6   :  { %v285_v27 = vpop.f32.mrf.mxu0  ;;  %v291_v28 = vpop.f32.mrf.mxu1 }
  0xe7   :  { %v210_v29 = vadd.f32 %v284_v25, %v245_v22  ;;  %v218_v30 = vadd.f32 %v290_v26, %v245_v22 }
  0xe8   :  { %v286_v31 = vpop.f32.mrf.mxu0  ;;  %v292_v32 = vpop.f32.mrf.mxu1 }
  0xe9   :  { %225 = vst.msk [vmem:[#allocation2] sm:$0xff] %vm224_vm0, %v210_v29  ;;  %227 = vst.msk [vmem:[#allocation2 + $0x10] sm:$0xff] %vm224_vm0, %v218_v30  ;;  %v287_v33 = vadd.f32 %v286_v31, %v285_v27  ;;  %v293_v34 = vadd.f32 %v292_v32, %v291_v28 }
  0xeb   :  { %v213_v35 = vadd.f32 %v287_v33, %v245_v22  ;;  %v221_v36 = vadd.f32 %v293_v34, %v245_v22 }
  0xed   :  { %226 = vst.msk [vmem:[#allocation2 + $0x8] sm:$0xff] %vm224_vm0, %v213_v35  ;;  %228 = vst.msk [vmem:[#allocation2 + $0x18] sm:$0xff] %vm224_vm0, %v221_v36 }
  0xee   :  { %346 = shalt.err (!%p343_p4)
}
  0xef   :  { %s358_s27 = smov 128   ;;  %s359_s28 = smov 8  }
  0xf0   :  { %240 = dma.vmem_to_hbm [thread:$0]  %s235_s1, 512, %s453_s3, [#allocation3], %s358_s27, %s358_s27, %s359_s28  }
  0xf1   :  { %355 = dma.done.wait [#allocation3], 512  }
  0xf2   :  { %356 = vsyncadd [#allocation3], 4294966784 }
  0xf3   :  { %244 = vsyncpa [#allocation3], 1 }

</bundles_post_ra>
